<compile_context>
chip_gen: v7x
topology: tpu7x:2x2x1
jax: 0.10.0
libtpu: 0.0.40
codegen_flags: <defaults>
</compile_context>

<pallas_src>
import math

import jax
import jax.numpy as jnp
from jax.experimental import pallas as pl
from jax.experimental.pallas import tpu as pltpu

_LANE = 128
_MIB = 1024 * 1024
_COL_CANDIDATES = (4096, 2048, 1024, 512, 256, 128)
_MIN_GRID_STEPS = 8


def l2_loss_kernel(pred_ref, label_ref, out_ref):
    # Elementwise squared error on the current (block_rows, block_cols) VMEM tile.
    d = pred_ref[...] - label_ref[...]
    out_ref[...] = d * d


def _choose_view(shape, n_elems, sub, max_block_cols):
    """Pick a 2D (rows, cols) view plus (block_cols, grid_c).

    Preferred: contiguous lane-dense reshape of the flat element stream (every block
    is a contiguous HBM range, unmasked stores). Fallback (N not a multiple of 128):
    natural trailing-dim view; Pallas masks the partial edge blocks.
    """
    best = None
    for c in _COL_CANDIDATES:
        if n_elems % c == 0:
            r = n_elems // c
            if best is None:
                best = (r, c)
            if r >= sub:  # widest cols that still fills the sublanes
                best = (r, c)
                break
    if best is not None:
        rows, cols = best
        return rows, cols, cols, 1  # whole-row blocks -> fully contiguous DMA

    if len(shape) >= 2:
        rows = int(math.prod(shape[:-1]))
        cols = int(shape[-1])
    else:
        rows, cols = 1, int(n_elems)
    if cols <= max_block_cols:
        block_cols = cols  # equal-to-full-dim block: always legal
        grid_c = 1
    else:
        block_cols = max_block_cols  # multiple of 128; edge block masked by Pallas
        grid_c = pl.cdiv(cols, block_cols)
    return rows, cols, block_cols, grid_c


def l2_loss(pred, label, *, target_block_bytes=4 * _MIB, max_block_cols=4096,
            small_input_bytes=1 * _MIB, donate_pred=False):
    """Elementwise L2 loss: (pred - label)**2, same shape/dtype as pred."""
    assert pred.shape == label.shape, "pred/label shape mismatch"
    assert pred.dtype == label.dtype, "pred/label dtype mismatch"
    orig_shape = pred.shape
    n_elems = int(math.prod(orig_shape))
    itemsize = jnp.dtype(pred.dtype).itemsize

    # Tiny / empty inputs: XLA's fused elementwise is already at roofline.
    if n_elems == 0 or n_elems * itemsize < small_input_bytes:
        return jnp.square(pred - label)

    # Dtype-aware sublane multiple: 8 for f32, 16 for bf16, 32 for int8/fp8.
    sub = max(8, 32 // itemsize)

    rows, cols, block_cols, grid_c = _choose_view(orig_shape, n_elems, sub, max_block_cols)

    # Row block sized for ~target_block_bytes per array per block.
    target_elems = max(1, target_block_bytes // itemsize)
    block_rows = max(sub, (target_elems // block_cols) // sub * sub)
    if block_rows >= rows:
        block_rows = rows  # equal-to-full-dim block: always legal
    grid_r = pl.cdiv(rows, block_rows)

    # Aim for >= _MIN_GRID_STEPS grid steps so v7x's two TensorCores both stay busy
    # and the double-buffered pipeline actually overlaps (also helps v5e/v6e ramp).
    if grid_r * grid_c < _MIN_GRID_STEPS and rows > sub:
        cand = max(sub, (rows // _MIN_GRID_STEPS) // sub * sub)
        if cand < block_rows:
            block_rows = cand
            grid_r = pl.cdiv(rows, block_rows)

    # Free row-major reshape (same element count) -- no HBM round-trip, unlike jnp.pad.
    p2 = pred.reshape(rows, cols)
    l2 = label.reshape(rows, cols)

    # VMEM budget: 3 arrays x 2 double-buffers x block + headroom; capped inside
    # v7x's 64 MiB per-TC VMEM, and explicitly above v5e's 16 MiB default scope.
    block_bytes = block_rows * block_cols * itemsize
    vmem_limit = int(min(max(6 * block_bytes + 4 * _MIB, 8 * _MIB), 48 * _MIB))

    out = pl.pallas_call(
        l2_loss_kernel,
        out_shape=jax.ShapeDtypeStruct((rows, cols), pred.dtype),
        grid_spec=pl.GridSpec(
            grid=(grid_r, grid_c),
            in_specs=[
                pl.BlockSpec((block_rows, block_cols), lambda i, j: (i, j)),
                pl.BlockSpec((block_rows, block_cols), lambda i, j: (i, j)),
            ],
            out_specs=pl.BlockSpec((block_rows, block_cols), lambda i, j: (i, j)),
        ),
        compiler_params=pltpu.CompilerParams(
            dimension_semantics=("parallel", "parallel"),
            vmem_limit_bytes=vmem_limit,
        ),
        cost_estimate=pl.CostEstimate(
            flops=2 * n_elems,
            transcendentals=0,
            bytes_accessed=3 * n_elems * itemsize,
        ),
        input_output_aliases={0: 0} if donate_pred else {},
    )(p2, l2)

    return out.reshape(orig_shape)


if __name__ == "__main__":
    key = jax.random.PRNGKey(0)

    # (shape, description) -- small, fast, and covering both code paths:
    #   * aligned contiguous path (N % 128 == 0), single- and multi-step grids
    #   * fallback path with Pallas-masked edge blocks (N not a multiple of 128)
    test_shapes = [
        (2, 4, 16, 16),    # NCHW demo shape; contiguous path, 1 grid step
        (4, 16, 64, 64),   # contiguous path, multi-step grid (row-split)
        (3, 5, 17, 13),    # misaligned -> fallback view + masked edge blocks
    ]

    ok = True
    for shape in test_shapes:
        key, k_pred, k_label = jax.random.split(key, 3)
        pred = jax.random.normal(k_pred, shape, dtype=jnp.float32)
        label = jax.random.normal(k_label, shape, dtype=jnp.float32)

        # small_input_bytes=0 forces the Pallas path even at these demo sizes.
        loss = l2_loss(pred, label, small_input_bytes=0)
        loss = jax.block_until_ready(loss)

        ref = jnp.square(pred - label)
        ok &= loss.shape == pred.shape and loss.dtype == pred.dtype
        ok &= bool(jnp.allclose(loss, ref, atol=1e-6, rtol=1e-6))

    assert ok
    print("KERNEL_OK")
</pallas_src>

<mosaic_0001>
module attributes {stable_mosaic.version = 11 : i64} {
  func.func @l2_loss_kernel(%arg0: i32, %arg1: i32, %arg2: memref<8x256xf32, #tpu.memory_space<vmem>>, %arg3: memref<8x256xf32, #tpu.memory_space<vmem>>, %arg4: memref<8x256xf32, #tpu.memory_space<vmem>>) attributes {dimension_semantics = [#tpu.dimension_semantics<parallel>, #tpu.dimension_semantics<parallel>], iteration_bounds = array<i64: 1, 1>, scalar_prefetch = 0 : i64, scratch_operands = 0 : i64, tpu.core_type = #tpu.core_type<tc>, window_params = [{transform_indices = @transform_0, window_bounds = array<i64: 8, 256>}, {transform_indices = @transform_1, window_bounds = array<i64: 8, 256>}, {transform_indices = @transform_2, window_bounds = array<i64: 8, 256>}]} {
    %c0 = arith.constant 0 : index
    %c0_0 = arith.constant 0 : index
    %0 = vector.load %arg2[%c0, %c0_0] : memref<8x256xf32, #tpu.memory_space<vmem>>, vector<8x256xf32>
    %c0_1 = arith.constant 0 : index
    %c0_2 = arith.constant 0 : index
    %1 = vector.load %arg3[%c0_1, %c0_2] : memref<8x256xf32, #tpu.memory_space<vmem>>, vector<8x256xf32>
    %2 = arith.subf %0, %1 : vector<8x256xf32>
    %3 = arith.mulf %2, %2 : vector<8x256xf32>
    %c0_3 = arith.constant 0 : index
    %c0_4 = arith.constant 0 : index
    %4 = vector.load %arg4[%c0_3, %c0_4] : memref<8x256xf32, #tpu.memory_space<vmem>>, vector<8x256xf32>
    tpu.vector_store %arg4[%c0_3, %c0_4], %3 {strides = array<i32>} : memref<8x256xf32, #tpu.memory_space<vmem>>, vector<8x256xf32>,
    return
  }
  func.func @transform_0(%arg0: i32, %arg1: i32) -> (i32, i32) {
    %c0_i32 = arith.constant 0 : i32
    return %arg0, %arg1 : i32, i32
  }
  func.func @transform_1(%arg0: i32, %arg1: i32) -> (i32, i32) {
    %c0_i32 = arith.constant 0 : i32
    return %arg0, %arg1 : i32, i32
  }
  func.func @transform_2(%arg0: i32, %arg1: i32) -> (i32, i32) {
    %c0_i32 = arith.constant 0 : i32
    return %arg0, %arg1 : i32, i32
  }
}

</mosaic_0001>

<bundles_post_ra>
// kernel: tpu_custom_call.1
= control target key start
LH: loop header
LB: loop body
LE: loop exit
PB: predicated region body
PF: predicated region fallthrough
CT: control target
= control target key end

     0   :  { %7 = vsyncpa [#allocation3], 0  ;;  %s191_s0 = inlined_call_operand.hbm [shape: f32[8,256], index: 0, kind: input, shape index: {}]   ;;  %s192_s1 = inlined_call_operand.hbm [shape: f32[8,256], index: 1, kind: input, shape index: {}]   ;;  %s193_s2 = inlined_call_operand.hbm [shape: f32[8,256], index: 2, kind: output, shape index: {}]  }
   0x1   :  { %8 = vsyncpa [#allocation6], 0 }
   0x2   :  { %9 = vsyncpa [#allocation4], 0  ;;  %s137_s9 = smov [#allocation2]   ;;  %s138_s11 = smov [#allocation5]  }
   0x3   :  { %s16_s10 = sshll.u32 %s137_s9, 4  ;;  %s26_s12 = sshll.u32 %s138_s11, 4  ;;  %s17_s10 = int_to_ptr.vmem [resolvable:$true] %s16_s10  ;;  %s27_s12 = int_to_ptr.vmem [resolvable:$true] %s26_s12 }
   0x4   :  { %s65_s15 = scalar_lea.hbm %s191_s0, 256 }
   0x5   :  { %p66_p0 = scmp.ne.s32.totalorder %s191_s0, %s65_s15  ;;  %p69_p1 = scmp.lt.u32.totalorder %s65_s15, %s191_s0 }
   0x7   :  { %p71_p2 = pnand %p69_p1, %p66_p0 }
   0x9   :  { %74 = shalt.err (!%p71_p2)
}
   0xa   :  { %s75_s20 = scalar_lea.vmem %s17_s10, 256  ;;  %p80_p4 = scmp.lt.s32.totalorder %s17_s10, %s17_s10 }
   0xb   :  { %p76_p3 = scmp.ne.s32.totalorder %s17_s10, %s75_s20  ;;  %p81_p5 = scmp.lt.s32.totalorder %s75_s20, %s75_s20 }
   0xd   :  { %p82_p6 = por %p81_p5, %p80_p4 }
   0xf   :  { %p83_p7 = pnand %p82_p6, %p76_p3 }
  0x11   :  { %86 = shalt.err (!%p83_p7)
}
  0x12   :  { %19 = dma.hbm_to_vmem [thread:$0]  %s191_s0, 256, %s17_s10, [#allocation3]  }
  0x13   :  { %s87_s25 = scalar_lea.hbm %s192_s1, 256 }
  0x14   :  { %p88_p8 = scmp.ne.s32.totalorder %s192_s1, %s87_s25  ;;  %p91_p9 = scmp.lt.u32.totalorder %s87_s25, %s192_s1 }
  0x16   :  { %p93_p10 = pnand %p91_p9, %p88_p8 }
  0x18   :  { %96 = shalt.err (!%p93_p10)
}
  0x19   :  { %s97_s30 = scalar_lea.vmem %s27_s12, 256  ;;  %p102_p12 = scmp.lt.s32.totalorder %s27_s12, %s27_s12 }
  0x1a   :  { %p98_p11 = scmp.ne.s32.totalorder %s27_s12, %s97_s30  ;;  %p103_p13 = scmp.lt.s32.totalorder %s97_s30, %s97_s30 }
  0x1c   :  { %p104_p0 = por %p103_p13, %p102_p12 }
  0x1e   :  { %p105_p1 = pnand %p104_p0, %p98_p11 }
  0x20   :  { %108 = shalt.err (!%p105_p1)
}
  0x21   :  { %29 = dma.hbm_to_vmem [thread:$0]  %s192_s1, 256, %s27_s12, [#allocation6]  }
  0x22   :  { %131 = dma.done.wait [#allocation3], 256  }
  0x23   :  { %132 = vsyncadd [#allocation3], 4294967040 }
  0x24   :  { %133 = dma.done.wait [#allocation6], 256  }
  0x25   :  { %134 = vsyncadd [#allocation6], 4294967040  ;;  %v36_v0 = vld [vmem:[#allocation2] sm:$0xff]  ;;  %v38_v1 = vld [vmem:[#allocation5] sm:$0xff]  ;;  %s139_s4 = smov [#allocation7]  }
  0x26   :  { %v37_v2 = vld [vmem:[#allocation2 + $0x8] sm:$0xff]  ;;  %v40_v3 = vsub.f32 %v36_v0, %v38_v1  ;;  %v39_v4 = vld [vmem:[#allocation5 + $0x8] sm:$0xff]  ;;  %s52_s5 = sshll.u32 %s139_s4, 4  ;;  %s53_s5 = int_to_ptr.vmem [resolvable:$true] %s52_s5 }
  0x27   :  { %v41_v5 = vsub.f32 %v37_v2, %v39_v4  ;;  %s109_s6 = scalar_lea.vmem %s53_s5, 256  ;;  %p114_p3 = scmp.lt.s32.totalorder %s53_s5, %s53_s5 }
  0x28   :  { %v42_v6 = vmul.f32 %v40_v3, %v40_v3  ;;  %p110_p2 = scmp.ne.s32.totalorder %s53_s5, %s109_s6  ;;  %p115_p4 = scmp.lt.s32.totalorder %s109_s6, %s109_s6 }
  0x29   :  { %v43_v7 = vmul.f32 %v41_v5, %v41_v5 }
  0x2a   :  { %44 = vst [vmem:[#allocation7] sm:$0xff] %v42_v6  ;;  %p116_p5 = por %p115_p4, %p114_p3 }
  0x2b   :  { %45 = vst [vmem:[#allocation7 + $0x8] sm:$0xff] %v43_v7 }
  0x2c   :  { %p117_p6 = pnand %p116_p5, %p110_p2 }
  0x2e   :  { %120 = shalt.err (!%p117_p6)
}
  0x2f   :  { %s121_s8 = scalar_lea.hbm %s193_s2, 256 }
  0x30   :  { %p122_p7 = scmp.ne.s32.totalorder %s193_s2, %s121_s8  ;;  %p125_p8 = scmp.lt.u32.totalorder %s121_s8, %s193_s2 }
  0x32   :  { %p127_p9 = pnand %p125_p8, %p122_p7 }
  0x34   :  { %130 = shalt.err (!%p127_p9)
}
  0x35   :  { %55 = dma.vmem_to_hbm [thread:$0]  %s53_s5, 256, %s193_s2, [#allocation4]  }
  0x36   :  { %135 = dma.done.wait [#allocation4], 256  }
  0x37   :  { %136 = vsyncadd [#allocation4], 4294967040 }
  0x38   :  { %59 = vsyncpa [#allocation3], 1 }
  0x39   :  { %60 = vsyncpa [#allocation6], 1 }
  0x3a   :  { %61 = vsyncpa [#allocation4], 1 }

</bundles_post_ra>
